<compile_context>
chip_gen: v7x
topology: tpu7x:2x2x1
jax: 0.10.0
libtpu: 0.0.40
codegen_flags: <defaults>
</compile_context>

<pallas_src>
import jax
import jax.numpy as jnp
from jax import lax
from jax.experimental import pallas as pl
from jax.experimental.pallas import tpu as pltpu

B, CIN, H, W = 2, 4, 16, 16   # batch, in-channels, spatial
COUT = 8                      # feature-extractor output channels
NUM_CLASSES = 10              # fc (1x1 conv) output channels
KH = KW = 3                   # conv kernel size
HW = H * W
KSIZE = KH * KW * CIN         # im2col contraction size (36)

# Packed-parameter buffer layout (sections start on sublane-aligned rows).
ROW_CW = 0                    # conv weight  (KSIZE, COUT)   rows  0..35
ROW_CB = 40                   # conv bias    (1, COUT)       row  40
ROW_FW = 48                   # fc weight    (COUT, NCLS)    rows 48..55
ROW_FB = 56                   # fc bias      (1, NCLS)       row  56
P_ROWS = 64
P_COLS = 16


def cnn_kernel(im2col_ref, pool_ref, params_ref, o_ref):
    """Whole batch in a single grid step.

    im2col_ref : (B*H*W, KSIZE)   pre-im2col'd, zero-padded conv input
    pool_ref   : (B, B*H*W)       block-average matrix (1/(H*W) per row block)
    params_ref : (P_ROWS, P_COLS) packed conv w/b + fc w/b
    o_ref      : (B, NUM_CLASSES) flattened output logits
    """
    conv_w = params_ref[ROW_CW:ROW_CW + KSIZE, 0:COUT]            # (36, 8)
    conv_b = params_ref[ROW_CB:ROW_CB + 1, 0:COUT]                # (1, 8)
    fc_w = params_ref[ROW_FW:ROW_FW + COUT, 0:NUM_CLASSES]        # (8, 10)
    fc_b = params_ref[ROW_FB:ROW_FB + 1, 0:NUM_CLASSES]           # (1, 10)

    # --- conv as ONE MXU matmul (K = 36), bias, ReLU. -------------------------
    acc = jnp.dot(im2col_ref[...], conv_w,
                  preferred_element_type=jnp.float32)             # (B*H*W, 8)
    acc = jnp.maximum(acc + conv_b, 0.0)

    # --- AdaptiveAvgPool2d((1,1)) via the precomputed pool matrix (MXU). ------
    pooled = jnp.dot(pool_ref[...], acc,
                     preferred_element_type=jnp.float32)          # (B, 8)

    # Dropout(p=0.0) is the identity (eval semantics).
    # TODO(synk): dropout with p > 0 / training mode not implemented.

    # --- fc: 1x1 conv on the (1,1) map == matmul; flatten is implicit. --------
    logits = jnp.dot(pooled, fc_w, preferred_element_type=jnp.float32)
    o_ref[...] = logits + fc_b                                    # (B, 10)


@jax.jit
def cnn_forward(x_nchw, conv_w, conv_b, fc_w, fc_b):
    # ---- wrapper-side layout plumbing (cheap, fusible / constant-folded) -----
    # NCHW -> NHWC, zero-pad for "same" 3x3 conv, then im2col into a single
    # contiguous lane-dense slab.  Column order (kh, kw, cin) matches
    # conv_w.reshape(KSIZE, COUT).
    x = jnp.transpose(x_nchw, (0, 2, 3, 1)).astype(jnp.float32)    # (B,H,W,CIN)
    x_pad = jnp.pad(x, ((0, 0), (1, 1), (1, 1), (0, 0)))           # pad=1
    taps = [x_pad[:, kh:kh + H, kw:kw + W, :]
            for kh in range(KH) for kw in range(KW)]               # 9 x (B,H,W,CIN)
    im2col = jnp.concatenate(taps, axis=-1).reshape(B * HW, KSIZE)  # (512, 36)

    # Block-average pooling matrix: pool[b, r] = 1/(H*W) iff row r is batch b.
    # No dependence on traced inputs -> constant-folded at compile time.
    pool = jnp.repeat(jnp.eye(B, dtype=jnp.float32), HW, axis=1) * (1.0 / HW)

    # Pack the four tiny parameter tensors into one buffer (one DMA).
    params = jnp.zeros((P_ROWS, P_COLS), jnp.float32)
    params = params.at[ROW_CW:ROW_CW + KSIZE, 0:COUT].set(
        conv_w.reshape(KSIZE, COUT).astype(jnp.float32))
    params = params.at[ROW_CB, 0:COUT].set(
        conv_b.reshape(COUT).astype(jnp.float32))
    params = params.at[ROW_FW:ROW_FW + COUT, 0:NUM_CLASSES].set(
        fc_w.astype(jnp.float32))
    params = params.at[ROW_FB, 0:NUM_CLASSES].set(
        fc_b.reshape(NUM_CLASSES).astype(jnp.float32))

    return pl.pallas_call(
        cnn_kernel,
        out_shape=jax.ShapeDtypeStruct((B, NUM_CLASSES), jnp.float32),
        grid=(1,),
        in_specs=[
            pl.BlockSpec((B * HW, KSIZE), lambda i: (0, 0)),
            pl.BlockSpec((B, B * HW),     lambda i: (0, 0)),
            pl.BlockSpec((P_ROWS, P_COLS), lambda i: (0, 0)),
        ],
        out_specs=pl.BlockSpec((B, NUM_CLASSES), lambda i: (0, 0)),
        compiler_params=pltpu.CompilerParams(
            dimension_semantics=("arbitrary",),
            allow_input_fusion=[True, True, True],
        ),
    )(im2col, pool, params)


def reference(x_nchw, conv_w, conv_b, fc_w, fc_b):
    """Pure-JAX reference matching the PyTorch forward pass."""
    x = jnp.transpose(x_nchw, (0, 2, 3, 1)).astype(jnp.float32)
    y = lax.conv_general_dilated(
        x, conv_w, window_strides=(1, 1), padding="SAME",
        dimension_numbers=("NHWC", "HWIO", "NHWC"))
    y = jnp.maximum(y + conv_b.reshape(1, 1, 1, COUT), 0.0)
    pooled = jnp.mean(y, axis=(1, 2))                          # (B, COUT)
    return pooled @ fc_w + fc_b.reshape(1, NUM_CLASSES)        # (B, NUM_CLASSES)


if __name__ == "__main__":
    key = jax.random.PRNGKey(0)
    kx, kw, kb, kfw, kfb = jax.random.split(key, 5)

    x = jax.random.normal(kx, (B, CIN, H, W), dtype=jnp.float32)
    conv_w = 0.1 * jax.random.normal(kw, (KH, KW, CIN, COUT), dtype=jnp.float32)
    conv_b = 0.1 * jax.random.normal(kb, (1, COUT), dtype=jnp.float32)
    fc_w = 0.1 * jax.random.normal(kfw, (COUT, NUM_CLASSES), dtype=jnp.float32)
    fc_b = 0.1 * jax.random.normal(kfb, (1, NUM_CLASSES), dtype=jnp.float32)

    out = cnn_forward(x, conv_w, conv_b, fc_w, fc_b)
    jax.block_until_ready(out)

    ref = reference(x, conv_w, conv_b, fc_w, fc_b)
    assert out.shape == (B, NUM_CLASSES), out.shape
    assert jnp.allclose(out, ref, atol=1e-4, rtol=1e-4), (out, ref)

    print("KERNEL_OK")
</pallas_src>

<mosaic_0001>
module attributes {stable_mosaic.version = 11 : i64} {
  func.func @cnn_kernel(%arg0: i32, %arg1: memref<512x36xf32, #tpu.memory_space<vmem>>, %arg2: memref<2x512xf32, #tpu.memory_space<vmem>>, %arg3: memref<64x16xf32, #tpu.memory_space<vmem>>, %arg4: memref<2x10xf32, #tpu.memory_space<vmem>>) attributes {dimension_semantics = [#tpu.dimension_semantics<arbitrary>], iteration_bounds = array<i64: 1>, scalar_prefetch = 0 : i64, scratch_operands = 0 : i64, tpu.core_type = #tpu.core_type<tc>, window_params = [{pipeline_mode = #tpu.pipeline_mode<synchronous>, transform_indices = @transform_0, window_bounds = array<i64: 512, 36>}, {pipeline_mode = #tpu.pipeline_mode<synchronous>, transform_indices = @transform_1, window_bounds = array<i64: 2, 512>}, {pipeline_mode = #tpu.pipeline_mode<synchronous>, transform_indices = @transform_2, window_bounds = array<i64: 64, 16>}, {pipeline_mode = #tpu.pipeline_mode<synchronous>, transform_indices = @transform_3, window_bounds = array<i64: 2, 10>}]} {
    %c0 = arith.constant 0 : index
    %c0_0 = arith.constant 0 : index
    %0 = vector.load %arg3[%c0, %c0_0] : memref<64x16xf32, #tpu.memory_space<vmem>>, vector<36x8xf32>
    %c40 = arith.constant 40 : index
    %c0_1 = arith.constant 0 : index
    %1 = vector.load %arg3[%c40, %c0_1] : memref<64x16xf32, #tpu.memory_space<vmem>>, vector<1x8xf32>
    %c48 = arith.constant 48 : index
    %c0_2 = arith.constant 0 : index
    %2 = vector.load %arg3[%c48, %c0_2] : memref<64x16xf32, #tpu.memory_space<vmem>>, vector<8x10xf32>
    %c56 = arith.constant 56 : index
    %c0_3 = arith.constant 0 : index
    %3 = vector.load %arg3[%c56, %c0_3] : memref<64x16xf32, #tpu.memory_space<vmem>>, vector<1x10xf32>
    %c0_4 = arith.constant 0 : index
    %c0_5 = arith.constant 0 : index
    %4 = vector.load %arg1[%c0_4, %c0_5] : memref<512x36xf32, #tpu.memory_space<vmem>>, vector<512x36xf32>
    %cst = arith.constant dense<0.000000e+00> : vector<512x8xf32>
    %5 = tpu.matmul %4, %0, %cst {dimension_numbers = #tpu.dot_dimension_numbers<[1], [0], [0], [1], [0, 0, 1, 1], [], []>} : vector<512x36xf32>, vector<36x8xf32>, vector<512x8xf32> -> vector<512x8xf32>
    %6 = vector.broadcast %1 : vector<1x8xf32> to vector<512x8xf32>
    %7 = arith.addf %5, %6 : vector<512x8xf32>
    %cst_6 = arith.constant 0.000000e+00 : f32
    %8 = vector.broadcast %cst_6 : f32 to vector<512x8xf32>
    %9 = arith.maximumf %7, %8 : vector<512x8xf32>
    %c0_7 = arith.constant 0 : index
    %c0_8 = arith.constant 0 : index
    %10 = vector.load %arg2[%c0_7, %c0_8] : memref<2x512xf32, #tpu.memory_space<vmem>>, vector<2x512xf32>
    %cst_9 = arith.constant dense<0.000000e+00> : vector<2x8xf32>
    %11 = tpu.matmul %10, %9, %cst_9 {dimension_numbers = #tpu.dot_dimension_numbers<[1], [0], [0], [1], [0, 0, 1, 1], [], []>} : vector<2x512xf32>, vector<512x8xf32>, vector<2x8xf32> -> vector<2x8xf32>
    %cst_10 = arith.constant dense<0.000000e+00> : vector<2x10xf32>
    %12 = tpu.matmul %11, %2, %cst_10 {dimension_numbers = #tpu.dot_dimension_numbers<[1], [0], [0], [1], [0, 0, 1, 1], [], []>} : vector<2x8xf32>, vector<8x10xf32>, vector<2x10xf32> -> vector<2x10xf32>
    %13 = vector.broadcast %3 : vector<1x10xf32> to vector<2x10xf32>
    %14 = arith.addf %12, %13 : vector<2x10xf32>
    %c0_11 = arith.constant 0 : index
    %c0_12 = arith.constant 0 : index
    %15 = vector.load %arg4[%c0_11, %c0_12] : memref<2x10xf32, #tpu.memory_space<vmem>>, vector<2x10xf32>
    tpu.vector_store %arg4[%c0_11, %c0_12], %14 {strides = array<i32>} : memref<2x10xf32, #tpu.memory_space<vmem>>, vector<2x10xf32>,
    return
  }
  func.func @transform_0(%arg0: i32) -> (i32, i32) {
    %c0_i32 = arith.constant 0 : i32
    %c0_i32_0 = arith.constant 0 : i32
    %c0_i32_1 = arith.constant 0 : i32
    return %c0_i32, %c0_i32_0 : i32, i32
  }
  func.func @transform_1(%arg0: i32) -> (i32, i32) {
    %c0_i32 = arith.constant 0 : i32
    %c0_i32_0 = arith.constant 0 : i32
    %c0_i32_1 = arith.constant 0 : i32
    return %c0_i32, %c0_i32_0 : i32, i32
  }
  func.func @transform_2(%arg0: i32) -> (i32, i32) {
    %c0_i32 = arith.constant 0 : i32
    %c0_i32_0 = arith.constant 0 : i32
    %c0_i32_1 = arith.constant 0 : i32
    return %c0_i32, %c0_i32_0 : i32, i32
  }
  func.func @transform_3(%arg0: i32) -> (i32, i32) {
    %c0_i32 = arith.constant 0 : i32
    %c0_i32_0 = arith.constant 0 : i32
    %c0_i32_1 = arith.constant 0 : i32
    return %c0_i32, %c0_i32_0 : i32, i32
  }
}

</mosaic_0001>

<bundles_post_ra>
// kernel: cnn_forward.1
= control target key start
LH: loop header
LB: loop body
LE: loop exit
PB: predicated region body
PF: predicated region fallthrough
CT: control target
= control target key end

     0   :  { %vm91_vm0 = vcmask 293888   ;;  %vm284_vm1 = vcmask 1043456   ;;  %s1873_s0 = inlined_call_operand.vmem [shape: f32[512,36], index: 0, kind: input, shape index: {}]   ;;  %s1874_s1 = inlined_call_operand.vmem [shape: f32[2,512], index: 1, kind: input, shape index: {}]   ;;  %s1875_s2 = inlined_call_operand.vmem [shape: f32[64,16], index: 2, kind: input, shape index: {}]   ;;  %s1876_s3 = inlined_call_operand.hbm [shape: f32[2,10], index: 3, kind: output, shape index: {}]  }
   0x1   :  { %v15_v0 = vld [vmem:[%s1875_s2] sm:$0xff]  ;;  %v16_v1 = vld [vmem:[%s1875_s2 + $0x8] sm:$0xff]  ;;  %v17_v2 = vld [vmem:[%s1875_s2 + $0x10] sm:$0xff] }
   0x2   :  { %v1314_v3 = vpack.c.bf16 %v16_v1, %v15_v0  ;;  %v18_v4 = vld [vmem:[%s1875_s2 + $0x18] sm:$0xff]  ;;  %v23_v5 = vld [vmem:[%s1873_s0] sm:$0xff]  ;;  %v24_v8 = vld [vmem:[%s1873_s0 + $0x8] sm:$0xff] }
   0x3   :  { %v1318_v6 = vpack.c.bf16 %v18_v4, %v17_v2  ;;  %1213 = vmatprep.mubr.msk.f32.mxu0 %vm91_vm0, %v23_v5  ;;  %v19_v7 = vld [vmem:[%s1875_s2 + $0x20] sm:$0xf]  ;;  %v65_v9 = vld [vmem:[%s1873_s0 + $0x150] sm:$0xff]  ;;  %v66_v11 = vld [vmem:[%s1873_s0 + $0x158] sm:$0xff] }
   0x4   :  { %1315 = vmatprep.subr.bf16.mxu0 %v1314_v3  ;;  %1386 = vmatprep.subr.bf16.mxu1 %v1314_v3  ;;  %v25_v10 = vld [vmem:[%s1873_s0 + $0x10] sm:$0xff]  ;;  %v67_v12 = vld [vmem:[%s1873_s0 + $0x160] sm:$0xff]  ;;  %v26_v13 = vld [vmem:[%s1873_s0 + $0x18] sm:$0xff] }
   0x5   :  { %1317 = vmatpush3.bf16.msra.mxu0 %v1314_v3  ;;  %1389 = vmatpush3.bf16.msra.mxu1 %v1314_v3  ;;  %v68_v14 = vld [vmem:[%s1873_s0 + $0x168] sm:$0xff]  ;;  %v27_v15 = vld [vmem:[%s1873_s0 + $0x20] sm:$0xff]  ;;  %v69_v16 = vld [vmem:[%s1873_s0 + $0x170] sm:$0xff] }
   0x6   :  { %1319 = vmatprep.subr.bf16.mxu0 %v1318_v6  ;;  %1387 = vmatprep.subr.bf16.mxu1 %v1318_v6  ;;  %v28_v17 = vld [vmem:[%s1873_s0 + $0x28] sm:$0xff]  ;;  %v70_v18 = vld [vmem:[%s1873_s0 + $0x178] sm:$0xff]  ;;  %v29_v19 = vld [vmem:[%s1873_s0 + $0x30] sm:$0xff] }
   0x7   :  { %1276 = vmatprep.mubr.msk.f32.mxu1 %vm91_vm0, %v65_v9  ;;  %v71_v20 = vld [vmem:[%s1873_s0 + $0x180] sm:$0xff]  ;;  %v30_v21 = vld [vmem:[%s1873_s0 + $0x38] sm:$0xff]  ;;  %v72_v22 = vld [vmem:[%s1873_s0 + $0x188] sm:$0xff] }
   0x8   :  { %v31_v23 = vld [vmem:[%s1873_s0 + $0x40] sm:$0xff]  ;;  %v73_v24 = vld [vmem:[%s1873_s0 + $0x190] sm:$0xff] }
   0x9   :  { %1321 = vmatpush3.bf16.msra.mxu0 %v1318_v6  ;;  %1390 = vmatpush3.bf16.msra.mxu1 %v1318_v6 }
   0xa   :  { %1211 = vmatprep.subr.msk.mxu0 %vm284_vm1, %v19_v7  ;;  %1388 = vmatprep.subr.msk.mxu1 %vm284_vm1, %v19_v7 }
   0xd   :  { %1212 = vmatpush3.msk.msra.mxu0 %vm284_vm1, %v19_v7  ;;  %1391 = vmatpush3.msk.msra.mxu1 %vm284_vm1, %v19_v7 }
   0xe   :  { %1214 = vmatmul.mubr.msk.f32.vlgmr.msra.gmra.mrb[0].mxu0 %vm91_vm0, %v24_v8  ;;  %1277 = vmatmul.mubr.msk.f32.vlgmr.msra.gmra.mrb[0].mxu1 %vm91_vm0, %v66_v11 }
   0xf   :  { %1216 = vmatprep.mubr.msk.f32.mxu0 %vm91_vm0, %v25_v10  ;;  %1279 = vmatprep.mubr.msk.f32.mxu1 %vm91_vm0, %v67_v12 }
  0x12   :  { %1217 = vmatmul.mubr.msk.f32.gmra.mrb[2].mxu0 %vm91_vm0, %v26_v13  ;;  %1280 = vmatmul.mubr.msk.f32.gmra.mrb[2].mxu1 %vm91_vm0, %v68_v14 }
  0x13   :  { %1219 = vmatprep.mubr.msk.f32.mxu0 %vm91_vm0, %v27_v15  ;;  %1282 = vmatprep.mubr.msk.f32.mxu1 %vm91_vm0, %v69_v16 }
  0x16   :  { %1220 = vmatmul.mubr.msk.f32.gmra.mrb[4].mxu0 %vm91_vm0, %v28_v17  ;;  %1283 = vmatmul.mubr.msk.f32.gmra.mrb[4].mxu1 %vm91_vm0, %v70_v18 }
  0x17   :  { %1222 = vmatprep.mubr.msk.f32.mxu0 %vm91_vm0, %v29_v19  ;;  %1285 = vmatprep.mubr.msk.f32.mxu1 %vm91_vm0, %v71_v20 }
  0x18   :  { %8 = vsyncpa [#allocation3], 0  ;;  %v32_v25 = vld [vmem:[%s1873_s0 + $0x48] sm:$0xff]  ;;  %v74_v26 = vld [vmem:[%s1873_s0 + $0x198] sm:$0xff]  ;;  %v1421_v7 = vmov 1983009808   ;;  %v743_v9 = vlaneseq }
  0x19   :  { %v33_v27 = vld [vmem:[%s1873_s0 + $0x50] sm:$0xff]  ;;  %v75_v28 = vld [vmem:[%s1873_s0 + $0x1a0] sm:$0xff]  ;;  %v34_v29 = vld [vmem:[%s1873_s0 + $0x58] sm:$0xff]  ;;  %v741_v8 = vunpack.c.l.s4 %v1421_v7  ;;  %vm1423_vm2 = vmmov 0   ;;  %vm904_vm3 = vcmask 64512   ;;  %s1424_s21 = smov [#allocation2]  }
  0x1a   :  { %1223 = vmatmul.mubr.msk.f32.gmra.mrb[6].mxu0 %vm91_vm0, %v30_v21  ;;  %1286 = vmatmul.mubr.msk.f32.gmra.mrb[6].mxu1 %vm91_vm0, %v72_v22  ;;  %v76_v30 = vld [vmem:[%s1873_s0 + $0x1a8] sm:$0xff]  ;;  %v35_v31 = vld [vmem:[%s1873_s0 + $0x60] sm:$0xff]  ;;  %v77_v32 = vld [vmem:[%s1873_s0 + $0x1b0] sm:$0xff]  ;;  %v744_v11 = vshrl.u32 %v743_v9, 7  ;;  %s986_s22 = sshll.u32 %s1424_s21, 4  ;;  %vm978_vm4 = vcmask 74752   ;;  %s987_s22 = int_to_ptr.vmem [resolvable:$true] %s986_s22 }
  0x1b   :  { %1225 = vmatprep.mubr.msk.f32.mxu0 %vm91_vm0, %v31_v23  ;;  %1288 = vmatprep.mubr.msk.f32.mxu1 %vm91_vm0, %v73_v24  ;;  %v36_v33 = vld [vmem:[%s1873_s0 + $0x68] sm:$0xff]  ;;  %v78_v34 = vld [vmem:[%s1873_s0 + $0x1b8] sm:$0xff]  ;;  %v37_v35 = vld [vmem:[%s1873_s0 + $0x70] sm:$0xff]  ;;  %v742_v10 = vunpack.c.0.s8 %v741_v8  ;;  %s1397_s23 = scalar_lea.vmem %s987_s22, 32  ;;  %p1402_p1 = scmp.lt.s32.totalorder %s987_s22, %s987_s22 }
  0x1c   :  { %v79_v36 = vld [vmem:[%s1873_s0 + $0x1c0] sm:$0xff]  ;;  %v38_v37 = vld [vmem:[%s1873_s0 + $0x78] sm:$0xff]  ;;  %v80_v38 = vld [vmem:[%s1873_s0 + $0x1c8] sm:$0xff]  ;;  %p1398_p0 = scmp.ne.s32.totalorder %s987_s22, %s1397_s23  ;;  %p1403_p2 = scmp.lt.s32.totalorder %s1397_s23, %s1397_s23 }
  0x1d   :  { %v39_v39 = vld [vmem:[%s1873_s0 + $0x80] sm:$0xff]  ;;  %v81_v40 = vld [vmem:[%s1873_s0 + $0x1d0] sm:$0xff]  ;;  %v40_v41 = vld [vmem:[%s1873_s0 + $0x88] sm:$0xff]  ;;  %v745_v12 = vsub.s32 %v742_v10, %v744_v11 }
  0x1e   :  { %1226 = vmatmul.mubr.msk.f32.gmra.mrb[8].mxu0 %vm91_vm0, %v32_v25  ;;  %1289 = vmatmul.mubr.msk.f32.gmra.mrb[8].mxu1 %vm91_vm0, %v74_v26  ;;  %v82_v42 = vld [vmem:[%s1873_s0 + $0x1d8] sm:$0xff]  ;;  %v41_v43 = vld [vmem:[%s1873_s0 + $0x90] sm:$0xff]  ;;  %v83_v44 = vld [vmem:[%s1873_s0 + $0x1e0] sm:$0xff]  ;;  %p1404_p3 = por %p1403_p2, %p1402_p1 }
  0x1f   :  { %1228 = vmatprep.mubr.msk.f32.mxu0 %vm91_vm0, %v33_v27  ;;  %1291 = vmatprep.mubr.msk.f32.mxu1 %vm91_vm0, %v75_v28  ;;  %v42_v45 = vld [vmem:[%s1873_s0 + $0x98] sm:$0xff]  ;;  %v84_v46 = vld [vmem:[%s1873_s0 + $0x1e8] sm:$0xff]  ;;  %v43_v47 = vld [vmem:[%s1873_s0 + $0xa0] sm:$0xff] }
  0x20   :  { %v85_v48 = vld [vmem:[%s1873_s0 + $0x1f0] sm:$0xff]  ;;  %v44_v49 = vld [vmem:[%s1873_s0 + $0xa8] sm:$0xff]  ;;  %v86_v50 = vld [vmem:[%s1873_s0 + $0x1f8] sm:$0xff]  ;;  %p1405_p4 = pnand %p1404_p3, %p1398_p0 }
  0x21   :  { %v45_v51 = vld [vmem:[%s1873_s0 + $0xb0] sm:$0xff]  ;;  %v46_v52 = vld [vmem:[%s1873_s0 + $0xb8] sm:$0xff]  ;;  %v47_v53 = vld [vmem:[%s1873_s0 + $0xc0] sm:$0xff] }
  0x22   :  { %1229 = vmatmul.mubr.msk.f32.gmra.mrb[10].mxu0 %vm91_vm0, %v34_v29  ;;  %1292 = vmatmul.mubr.msk.f32.gmra.mrb[10].mxu1 %vm91_vm0, %v76_v30  ;;  %v48_v54 = vld [vmem:[%s1873_s0 + $0xc8] sm:$0xff]  ;;  %v49_v55 = vld [vmem:[%s1873_s0 + $0xd0] sm:$0xff]  ;;  %v50_v56 = vld [vmem:[%s1873_s0 + $0xd8] sm:$0xff] }
  0x23   :  { %1231 = vmatprep.mubr.msk.f32.mxu0 %vm91_vm0, %v35_v31  ;;  %1294 = vmatprep.mubr.msk.f32.mxu1 %vm91_vm0, %v77_v32  ;;  %v51_v57 = vld [vmem:[%s1873_s0 + $0xe0] sm:$0xff]  ;;  %v52_v58 = vld [vmem:[%s1873_s0 + $0xe8] sm:$0xff]  ;;  %v53_v59 = vld [vmem:[%s1873_s0 + $0xf0] sm:$0xff] }
  0x24   :  { %v54_v60 = vld [vmem:[%s1873_s0 + $0xf8] sm:$0xff]  ;;  %v55_v61 = vld [vmem:[%s1873_s0 + $0x100] sm:$0xff]  ;;  %v56_v62 = vld [vmem:[%s1873_s0 + $0x108] sm:$0xff] }
  0x25   :  { %v57_v63 = vld [vmem:[%s1873_s0 + $0x110] sm:$0xff]  ;;  %v58_v0 = vld [vmem:[%s1873_s0 + $0x118] sm:$0xff]  ;;  %v59_v1 = vld [vmem:[%s1873_s0 + $0x120] sm:$0xff] }
  0x26   :  { %1232 = vmatmul.mubr.msk.f32.gmra.mrb[12].mxu0 %vm91_vm0, %v36_v33  ;;  %1295 = vmatmul.mubr.msk.f32.gmra.mrb[12].mxu1 %vm91_vm0, %v78_v34  ;;  %v60_v2 = vld [vmem:[%s1873_s0 + $0x128] sm:$0xff]  ;;  %v61_v3 = vld [vmem:[%s1873_s0 + $0x130] sm:$0xff]  ;;  %v62_v4 = vld [vmem:[%s1873_s0 + $0x138] sm:$0xff] }
  0x27   :  { %1234 = vmatprep.mubr.msk.f32.mxu0 %vm91_vm0, %v37_v35  ;;  %1297 = vmatprep.mubr.msk.f32.mxu1 %vm91_vm0, %v79_v36  ;;  %v63_v5 = vld [vmem:[%s1873_s0 + $0x140] sm:$0xff]  ;;  %v64_v6 = vld [vmem:[%s1873_s0 + $0x148] sm:$0xff] }
  0x28   :  { %v737_v13 = vld [vmem:[%s1874_s1] sm:$0xff]  ;;  %v1728_v18 = vld [vmem:[%s1875_s2 + $0x28] ss:$0 sm:$0xff] }
  0x29   :  { %v1719_v14 = vrot.slane %v737_v13, %v745_v12  ;;  %v739_v16 = vcombine.high %v737_v13, %v737_v13 }
  0x2a   :  { %1235 = vmatmul.mubr.msk.f32.gmra.mrb[14].mxu0 %vm91_vm0, %v38_v37  ;;  %1298 = vmatmul.mubr.msk.f32.gmra.mrb[14].mxu1 %vm91_vm0, %v80_v38 }
  0x2b   :  { %1237 = vmatprep.mubr.msk.f32.mxu0 %vm91_vm0, %v39_v39  ;;  %1300 = vmatprep.mubr.msk.f32.mxu1 %vm91_vm0, %v81_v40  ;;  %v754_v15 = vcombine.high %v1719_v14, %v1719_v14  ;;  %v1723_v17 = vrot.slane %v739_v16, %v745_v12 }
  0x2e   :  { %1238 = vmatmul.mubr.msk.f32.gmra.mrb[16].mxu0 %vm91_vm0, %v40_v41  ;;  %1301 = vmatmul.mubr.msk.f32.gmra.mrb[16].mxu1 %vm91_vm0, %v82_v42 }
  0x2f   :  { %1240 = vmatprep.mubr.msk.f32.mxu0 %vm91_vm0, %v41_v43  ;;  %1303 = vmatprep.mubr.msk.f32.mxu1 %vm91_vm0, %v83_v44 }
  0x32   :  { %1241 = vmatmul.mubr.msk.f32.gmra.mrb[18].mxu0 %vm91_vm0, %v42_v45  ;;  %1304 = vmatmul.mubr.msk.f32.gmra.mrb[18].mxu1 %vm91_vm0, %v84_v46 }
  0x33   :  { %1243 = vmatprep.mubr.msk.f32.mxu0 %vm91_vm0, %v43_v47  ;;  %1306 = vmatprep.mubr.msk.f32.mxu1 %vm91_vm0, %v85_v48 }
  0x36   :  { %1244 = vmatmul.mubr.msk.f32.gmra.mrb[20].mxu0 %vm91_vm0, %v44_v49  ;;  %1307 = vmatmul.mubr.msk.f32.gmra.mrb[20].mxu1 %vm91_vm0, %v86_v50 }
  0x37   :  { %1246 = vmatprep.mubr.msk.f32.mxu0 %vm91_vm0, %v45_v51  ;;  %824 = vmatprep.mubr.f32.mxu1 %v754_v15 }
  0x3a   :  { %1247 = vmatmul.mubr.msk.f32.gmra.mrb[22].mxu0 %vm91_vm0, %v46_v52 }
  0x3b   :  { %1249 = vmatprep.mubr.msk.f32.mxu0 %vm91_vm0, %v47_v53 }
  0x3e   :  { %1250 = vmatmul.mubr.msk.f32.gmra.mrb[24].mxu0 %vm91_vm0, %v48_v54 }
  0x3f   :  { %1252 = vmatprep.mubr.msk.f32.mxu0 %vm91_vm0, %v49_v55 }
  0x42   :  { %1253 = vmatmul.mubr.msk.f32.gmra.mrb[26].mxu0 %vm91_vm0, %v50_v56 }
  0x43   :  { %1255 = vmatprep.mubr.msk.f32.mxu0 %vm91_vm0, %v51_v57 }
  0x46   :  { %1256 = vmatmul.mubr.msk.f32.gmra.mrb[28].mxu0 %vm91_vm0, %v52_v58 }
  0x47   :  { %1258 = vmatprep.mubr.msk.f32.mxu0 %vm91_vm0, %v53_v59 }
  0x4a   :  { %1259 = vmatmul.mubr.msk.f32.gmra.mrb[30].mxu0 %vm91_vm0, %v54_v60 }
  0x4b   :  { %1261 = vmatprep.mubr.msk.f32.mxu0 %vm91_vm0, %v55_v61 }
  0x4e   :  { %1262 = vmatmul.mubr.msk.f32.gmra.mrb[32].mxu0 %vm91_vm0, %v56_v62 }
  0x4f   :  { %1264 = vmatprep.mubr.msk.f32.mxu0 %vm91_vm0, %v57_v63 }
  0x52   :  { %1265 = vmatmul.mubr.msk.f32.gmra.mrb[34].mxu0 %vm91_vm0, %v58_v0 }
  0x53   :  { %1267 = vmatprep.mubr.msk.f32.mxu0 %vm91_vm0, %v59_v1 }
  0x56   :  { %1268 = vmatmul.mubr.msk.f32.gmra.mrb[36].mxu0 %vm91_vm0, %v60_v2 }
  0x57   :  { %1270 = vmatprep.mubr.msk.f32.mxu0 %vm91_vm0, %v61_v3 }
  0x5a   :  { %1271 = vmatmul.mubr.msk.f32.gmra.mrb[38].mxu0 %vm91_vm0, %v62_v4 }
  0x5b   :  { %1273 = vmatprep.mubr.msk.f32.mxu0 %vm91_vm0, %v63_v5 }
  0x5e   :  { %1274 = vmatmul.mubr.msk.f32.gmra.mrb[40].mxu0 %vm91_vm0, %v64_v6 }
  0xe1   :  { %v1215_v19 = vpop.f32.mrb[0].mxu0  ;;  %v1278_v20 = vpop.f32.mrb[0].mxu1 }
  0xe2   :  { %v360_v21 = vadd.f32 %v1215_v19, %v1728_v18  ;;  %v354_v22 = vpop.f32.mrb[1].mxu0  ;;  %v570_v23 = vadd.f32 %v1278_v20, %v1728_v18  ;;  %v564_v24 = vpop.f32.mrb[1].mxu1 }
  0xe3   :  { %v355_v25 = vadd.f32 %v1728_v18, %v354_v22  ;;  %v565_v26 = vadd.f32 %v1728_v18, %v564_v24 }
  0xe4   :  { %v674_v27 = vmax.f32 %v360_v21, 0.0  ;;  %v716_v28 = vmax.f32 %v570_v23, 0.0 }
  0xe5   :  { %v673_v29 = vmax.f32 %v355_v25, 0.0  ;;  %v1218_v30 = vpop.f32.mrb[2].mxu0  ;;  %v715_v31 = vmax.f32 %v565_v26, 0.0  ;;  %v1281_v32 = vpop.f32.mrb[2].mxu1 }
  0xe6   :  { %v370_v33 = vadd.f32 %v1218_v30, %v1728_v18  ;;  %v364_v34 = vpop.f32.mrb[3].mxu0  ;;  %v580_v35 = vadd.f32 %v1281_v32, %v1728_v18  ;;  %v574_v36 = vpop.f32.mrb[3].mxu1 }
  0xe7   :  { %v1736_v37 = vpack.c.bf16 %v674_v27, %v673_v29  ;;  %v365_v38 = vadd.f32 %v1728_v18, %v364_v34  ;;  %v1739_v39 = vpack.c.bf16 %v716_v28, %v715_v31  ;;  %v575_v40 = vadd.f32 %v1728_v18, %v574_v36 }
  0xe8   :  { %v676_v41 = vmax.f32 %v370_v33, 0.0  ;;  %v718_v42 = vmax.f32 %v580_v35, 0.0 }
  0xe9   :  { %v675_v43 = vmax.f32 %v365_v38, 0.0  ;;  %v1221_v44 = vpop.f32.mrb[4].mxu0  ;;  %v717_v45 = vmax.f32 %v575_v40, 0.0  ;;  %v1284_v46 = vpop.f32.mrb[4].mxu1 }
  0xea   :  { %v380_v47 = vadd.f32 %v1221_v44, %v1728_v18  ;;  %v374_v48 = vpop.f32.mrb[5].mxu0  ;;  %v590_v49 = vadd.f32 %v1284_v46, %v1728_v18  ;;  %v584_v50 = vpop.f32.mrb[5].mxu1 }
  0xeb   :  { %v1744_v51 = vpack.c.bf16 %v676_v41, %v675_v43  ;;  %v375_v52 = vadd.f32 %v1728_v18, %v374_v48  ;;  %v1747_v53 = vpack.c.bf16 %v718_v42, %v717_v45  ;;  %v585_v54 = vadd.f32 %v1728_v18, %v584_v50 }
  0xec   :  { %v678_v55 = vmax.f32 %v380_v47, 0.0  ;;  %v720_v56 = vmax.f32 %v590_v49, 0.0 }
  0xed   :  { %v677_v57 = vmax.f32 %v375_v52, 0.0  ;;  %v1224_v58 = vpop.f32.mrb[6].mxu0  ;;  %v719_v59 = vmax.f32 %v585_v54, 0.0  ;;  %v1287_v60 = vpop.f32.mrb[6].mxu1 }
  0xee   :  { %v390_v61 = vadd.f32 %v1224_v58, %v1728_v18  ;;  %v384_v62 = vpop.f32.mrb[7].mxu0  ;;  %v600_v63 = vadd.f32 %v1287_v60, %v1728_v18  ;;  %v594_v0 = vpop.f32.mrb[7].mxu1 }
  0xef   :  { %v1752_v1 = vpack.c.bf16 %v678_v55, %v677_v57  ;;  %v385_v2 = vadd.f32 %v1728_v18, %v384_v62  ;;  %v1755_v3 = vpack.c.bf16 %v720_v56, %v719_v59  ;;  %v595_v4 = vadd.f32 %v1728_v18, %v594_v0 }
  0xf0   :  { %v680_v5 = vmax.f32 %v390_v61, 0.0  ;;  %v722_v6 = vmax.f32 %v600_v63, 0.0 }
  0xf1   :  { %v679_v7 = vmax.f32 %v385_v2, 0.0  ;;  %v1227_v8 = vpop.f32.mrb[8].mxu0  ;;  %v721_v9 = vmax.f32 %v595_v4, 0.0  ;;  %v1290_v10 = vpop.f32.mrb[8].mxu1 }
  0xf2   :  { %v400_v11 = vadd.f32 %v1227_v8, %v1728_v18  ;;  %v394_v12 = vpop.f32.mrb[9].mxu0  ;;  %v610_v13 = vadd.f32 %v1290_v10, %v1728_v18  ;;  %v604_v15 = vpop.f32.mrb[9].mxu1 }
  0xf3   :  { %v1760_v16 = vpack.c.bf16 %v680_v5, %v679_v7  ;;  %v395_v19 = vadd.f32 %v1728_v18, %v394_v12  ;;  %v1763_v20 = vpack.c.bf16 %v722_v6, %v721_v9  ;;  %v605_v21 = vadd.f32 %v1728_v18, %v604_v15 }
  0xf4   :  { %v682_v22 = vmax.f32 %v400_v11, 0.0  ;;  %v724_v23 = vmax.f32 %v610_v13, 0.0 }
  0xf5   :  { %v681_v24 = vmax.f32 %v395_v19, 0.0  ;;  %v1230_v25 = vpop.f32.mrb[10].mxu0  ;;  %v723_v26 = vmax.f32 %v605_v21, 0.0  ;;  %v1293_v27 = vpop.f32.mrb[10].mxu1 }
  0xf6   :  { %v410_v28 = vadd.f32 %v1230_v25, %v1728_v18  ;;  %v404_v29 = vpop.f32.mrb[11].mxu0  ;;  %v620_v30 = vadd.f32 %v1293_v27, %v1728_v18  ;;  %v614_v31 = vpop.f32.mrb[11].mxu1 }
  0xf7   :  { %v1768_v32 = vpack.c.bf16 %v682_v22, %v681_v24  ;;  %v405_v33 = vadd.f32 %v1728_v18, %v404_v29  ;;  %v1771_v34 = vpack.c.bf16 %v724_v23, %v723_v26  ;;  %v615_v35 = vadd.f32 %v1728_v18, %v614_v31 }
  0xf8   :  { %v684_v36 = vmax.f32 %v410_v28, 0.0  ;;  %v726_v38 = vmax.f32 %v620_v30, 0.0 }
  0xf9   :  { %v683_v40 = vmax.f32 %v405_v33, 0.0  ;;  %v1233_v41 = vpop.f32.mrb[12].mxu0  ;;  %v725_v42 = vmax.f32 %v615_v35, 0.0  ;;  %v1296_v43 = vpop.f32.mrb[12].mxu1 }
  0xfa   :  { %v420_v44 = vadd.f32 %v1233_v41, %v1728_v18  ;;  %v414_v45 = vpop.f32.mrb[13].mxu0  ;;  %v630_v46 = vadd.f32 %v1296_v43, %v1728_v18  ;;  %v624_v47 = vpop.f32.mrb[13].mxu1 }
  0xfb   :  { %v1776_v48 = vpack.c.bf16 %v684_v36, %v683_v40  ;;  %v415_v49 = vadd.f32 %v1728_v18, %v414_v45  ;;  %v1779_v50 = vpack.c.bf16 %v726_v38, %v725_v42  ;;  %v625_v52 = vadd.f32 %v1728_v18, %v624_v47 }
  0xfc   :  { %v686_v54 = vmax.f32 %v420_v44, 0.0  ;;  %v728_v55 = vmax.f32 %v630_v46, 0.0 }
  0xfd   :  { %v685_v56 = vmax.f32 %v415_v49, 0.0  ;;  %v1236_v57 = vpop.f32.mrb[14].mxu0  ;;  %v727_v58 = vmax.f32 %v625_v52, 0.0  ;;  %v1299_v59 = vpop.f32.mrb[14].mxu1 }
  0xfe   :  { %v430_v60 = vadd.f32 %v1236_v57, %v1728_v18  ;;  %v424_v61 = vpop.f32.mrb[15].mxu0  ;;  %v640_v62 = vadd.f32 %v1299_v59, %v1728_v18  ;;  %v634_v63 = vpop.f32.mrb[15].mxu1 }
  0xff   :  { %v1784_v0 = vpack.c.bf16 %v686_v54, %v685_v56  ;;  %v425_v2 = vadd.f32 %v1728_v18, %v424_v61  ;;  %v1787_v4 = vpack.c.bf16 %v728_v55, %v727_v58  ;;  %v635_v5 = vadd.f32 %v1728_v18, %v634_v63 }
 0x100   :  { %v688_v6 = vmax.f32 %v430_v60, 0.0  ;;  %v730_v7 = vmax.f32 %v640_v62, 0.0 }
 0x101   :  { %v687_v8 = vmax.f32 %v425_v2, 0.0  ;;  %v1239_v9 = vpop.f32.mrb[16].mxu0  ;;  %v729_v10 = vmax.f32 %v635_v5, 0.0  ;;  %v1302_v11 = vpop.f32.mrb[16].mxu1 }
 0x102   :  { %v440_v12 = vadd.f32 %v1239_v9, %v1728_v18  ;;  %v434_v13 = vpop.f32.mrb[17].mxu0  ;;  %v650_v15 = vadd.f32 %v1302_v11, %v1728_v18  ;;  %v644_v19 = vpop.f32.mrb[17].mxu1 }
 0x103   :  { %v1792_v21 = vpack.c.bf16 %v688_v6, %v687_v8  ;;  %v435_v22 = vadd.f32 %v1728_v18, %v434_v13  ;;  %v1795_v23 = vpack.c.bf16 %v730_v7, %v729_v10  ;;  %v645_v24 = vadd.f32 %v1728_v18, %v644_v19 }
 0x104   :  { %v690_v25 = vmax.f32 %v440_v12, 0.0  ;;  %v732_v26 = vmax.f32 %v650_v15, 0.0 }
 0x105   :  { %v689_v27 = vmax.f32 %v435_v22, 0.0  ;;  %v1242_v28 = vpop.f32.mrb[18].mxu0  ;;  %v731_v29 = vmax.f32 %v645_v24, 0.0  ;;  %v1305_v30 = vpop.f32.mrb[18].mxu1 }
 0x106   :  { %v450_v31 = vadd.f32 %v1242_v28, %v1728_v18  ;;  %v444_v33 = vpop.f32.mrb[19].mxu0  ;;  %v660_v35 = vadd.f32 %v1305_v30, %v1728_v18  ;;  %v654_v36 = vpop.f32.mrb[19].mxu1 }
 0x107   :  { %v1322_v38 = vpack.c.bf16 %v690_v25, %v689_v27  ;;  %v445_v40 = vadd.f32 %v1728_v18, %v444_v33  ;;  %v1801_v41 = vpack.c.bf16 %v732_v26, %v731_v29  ;;  %v655_v42 = vadd.f32 %v1728_v18, %v654_v36 }
 0x108   :  { %v692_v43 = vmax.f32 %v450_v31, 0.0  ;;  %v734_v44 = vmax.f32 %v660_v35, 0.0 }
 0x109   :  { %v691_v45 = vmax.f32 %v445_v40, 0.0  ;;  %v1245_v46 = vpop.f32.mrb[20].mxu0  ;;  %1323 = vmatprep.subr.bf16.mxu1 %v1322_v38  ;;  %v733_v47 = vmax.f32 %v655_v42, 0.0  ;;  %v1308_v49 = vpop.f32.mrb[20].mxu1 }
 0x10a   :  { %v460_v52 = vadd.f32 %v1245_v46, %v1728_v18  ;;  %v454_v54 = vpop.f32.mrb[21].mxu0  ;;  %1325 = vmatpush3.bf16.msra.mxu1 %v1736_v37  ;;  %v670_v55 = vadd.f32 %v1308_v49, %v1728_v18  ;;  %v664_v56 = vpop.f32.mrb[21].mxu1 }
 0x10b   :  { %v1326_v57 = vpack.c.bf16 %v692_v43, %v691_v45  ;;  %v455_v58 = vadd.f32 %v1728_v18, %v454_v54  ;;  %v1808_v59 = vpack.c.bf16 %v734_v44, %v733_v47  ;;  %v665_v60 = vadd.f32 %v1728_v18, %v664_v56 }
 0x10c   :  { %v694_v61 = vmax.f32 %v460_v52, 0.0  ;;  %v736_v62 = vmax.f32 %v670_v55, 0.0 }
 0x10d   :  { %v693_v63 = vmax.f32 %v455_v58, 0.0  ;;  %v1248_v2 = vpop.f32.mrb[22].mxu0  ;;  %1327 = vmatprep.subr.bf16.mxu1 %v1326_v57  ;;  %v735_v5 = vmax.f32 %v665_v60, 0.0 }
 0x10e   :  { %v470_v6 = vadd.f32 %v1248_v2, %v1728_v18  ;;  %v464_v7 = vpop.f32.mrb[23].mxu0  ;;  %1329 = vmatpush3.bf16.msra.mxu1 %v1744_v51 }
 0x10f   :  { %v1330_v37 = vpack.c.bf16 %v694_v61, %v693_v63  ;;  %v465_v8 = vadd.f32 %v1728_v18, %v464_v7  ;;  %v1814_v9 = vpack.c.bf16 %v736_v62, %v735_v5  ;;  %v755_v62 = vcombine.high %v1723_v17, %v1723_v17 }
 0x110   :  { %v696_v10 = vmax.f32 %v470_v6, 0.0 }
 0x111   :  { %v695_v11 = vmax.f32 %v465_v8, 0.0  ;;  %v1251_v12 = vpop.f32.mrb[24].mxu0  ;;  %1331 = vmatprep.subr.bf16.mxu1 %v1330_v37 }
 0x112   :  { %v480_v13 = vadd.f32 %v1251_v12, %v1728_v18  ;;  %v474_v15 = vpop.f32.mrb[25].mxu0  ;;  %1333 = vmatpush3.bf16.msra.mxu1 %v1752_v1 }
 0x113   :  { %v1334_v19 = vpack.c.bf16 %v696_v10, %v695_v11  ;;  %v475_v22 = vadd.f32 %v1728_v18, %v474_v15 }
 0x114   :  { %v698_v24 = vmax.f32 %v480_v13, 0.0 }
 0x115   :  { %v697_v25 = vmax.f32 %v475_v22, 0.0  ;;  %v1254_v51 = vpop.f32.mrb[26].mxu0  ;;  %1335 = vmatprep.subr.bf16.mxu1 %v1334_v19 }
 0x116   :  { %v490_v26 = vadd.f32 %v1254_v51, %v1728_v18  ;;  %v484_v27 = vpop.f32.mrb[27].mxu0  ;;  %1337 = vmatpush3.bf16.msra.mxu1 %v1760_v16 }
 0x117   :  { %v1338_v28 = vpack.c.bf16 %v698_v24, %v697_v25  ;;  %v485_v29 = vadd.f32 %v1728_v18, %v484_v27 }
 0x118   :  { %v700_v30 = vmax.f32 %v490_v26, 0.0 }
 0x119   :  { %v699_v31 = vmax.f32 %v485_v29, 0.0  ;;  %v1257_v33 = vpop.f32.mrb[28].mxu0  ;;  %1339 = vmatprep.subr.bf16.mxu1 %v1338_v28 }
 0x11a   :  { %v500_v1 = vadd.f32 %v1257_v33, %v1728_v18  ;;  %v494_v35 = vpop.f32.mrb[29].mxu0  ;;  %1341 = vmatpush3.bf16.msra.mxu1 %v1768_v32 }
 0x11b   :  { %v1342_v36 = vpack.c.bf16 %v700_v30, %v699_v31  ;;  %v495_v38 = vadd.f32 %v1728_v18, %v494_v35 }
 0x11c   :  { %v702_v40 = vmax.f32 %v500_v1, 0.0 }
 0x11d   :  { %v701_v42 = vmax.f32 %v495_v38, 0.0  ;;  %v1260_v43 = vpop.f32.mrb[30].mxu0  ;;  %1343 = vmatprep.subr.bf16.mxu1 %v1342_v36 }
 0x11e   :  { %v510_v16 = vadd.f32 %v1260_v43, %v1728_v18  ;;  %v504_v44 = vpop.f32.mrb[31].mxu0  ;;  %1345 = vmatpush3.bf16.msra.mxu1 %v1776_v48 }
 0x11f   :  { %v1346_v45 = vpack.c.bf16 %v702_v40, %v701_v42  ;;  %v505_v46 = vadd.f32 %v1728_v18, %v504_v44 }
 0x120   :  { %v704_v47 = vmax.f32 %v510_v16, 0.0 }
 0x121   :  { %v703_v49 = vmax.f32 %v505_v46, 0.0  ;;  %1347 = vmatprep.subr.bf16.mxu1 %v1346_v45  ;;  %v1263_v52 = vpop.f32.mrb[32].mxu0 }
 0x122   :  { %v520_v32 = vadd.f32 %v1263_v52, %v1728_v18  ;;  %1349 = vmatpush3.bf16.msra.mxu1 %v1784_v0  ;;  %v514_v54 = vpop.f32.mrb[33].mxu0 }
 0x123   :  { %v1350_v55 = vpack.c.bf16 %v704_v47, %v703_v49  ;;  %v515_v56 = vadd.f32 %v1728_v18, %v514_v54 }
 0x124   :  { %v706_v57 = vmax.f32 %v520_v32, 0.0 }
 0x125   :  { %v705_v58 = vmax.f32 %v515_v56, 0.0  ;;  %1351 = vmatprep.subr.bf16.mxu1 %v1350_v55  ;;  %v1266_v60 = vpop.f32.mrb[34].mxu0 }
 0x126   :  { %v530_v48 = vadd.f32 %v1266_v60, %v1728_v18  ;;  %1353 = vmatpush3.bf16.msra.mxu1 %v1792_v21  ;;  %v524_v61 = vpop.f32.mrb[35].mxu0 }
 0x127   :  { %v1356_v63 = vpack.c.bf16 %v706_v57, %v705_v58  ;;  %v525_v2 = vadd.f32 %v1728_v18, %v524_v61  ;;  %1355 = vmatprep.subr.bf16.mxu1 %v1763_v20 }
 0x128   :  { %v708_v0 = vmax.f32 %v530_v48, 0.0 }
 0x129   :  { %v707_v5 = vmax.f32 %v525_v2, 0.0  ;;  %v1269_v6 = vpop.f32.mrb[36].mxu0  ;;  %825 = vmatmul.mubr.f32.vlgmr.msra.gmra.mrb[22].mxu1 %v1719_v14 }
 0x12a   :  { %v540_v7 = vadd.f32 %v1269_v6, %v1728_v18  ;;  %1357 = vmatpush3.bf16.msra.mxu1 %v1356_v63  ;;  %v534_v37 = vpop.f32.mrb[37].mxu0  ;;  %894 = vmatprep.mubr.f32.mxu1 %v755_v62 }
 0x12b   :  { %v1360_v21 = vpack.c.bf16 %v708_v0, %v707_v5  ;;  %v535_v8 = vadd.f32 %v1728_v18, %v534_v37  ;;  %1359 = vmatprep.subr.bf16.mxu1 %v1771_v34 }
 0x12c   :  { %v710_v10 = vmax.f32 %v540_v7, 0.0 }
 0x12d   :  { %v709_v11 = vmax.f32 %v535_v8, 0.0  ;;  %v1272_v12 = vpop.f32.mrb[38].mxu0 }
 0x12e   :  { %v550_v20 = vadd.f32 %v1272_v12, %v1728_v18  ;;  %1361 = vmatpush3.bf16.msra.mxu1 %v1360_v21  ;;  %v544_v13 = vpop.f32.mrb[39].mxu0 }
 0x12f   :  { %v1364_v15 = vpack.c.bf16 %v710_v10, %v709_v11  ;;  %v545_v14 = vadd.f32 %v1728_v18, %v544_v13  ;;  %1363 = vmatprep.subr.bf16.mxu1 %v1779_v50  ;;  %v21_v50 = vld [vmem:[%s1875_s2 + $0x30] sm:$0xff] }
 0x130   :  { %v712_v19 = vmax.f32 %v550_v20, 0.0 }
 0x131   :  { %v711_v22 = vmax.f32 %v545_v14, 0.0  ;;  %v1275_v24 = vpop.f32.mrb[40].mxu0 }
 0x132   :  { %v560_v25 = vadd.f32 %v1275_v24, %v1728_v18  ;;  %1365 = vmatpush3.bf16.msra.mxu1 %v1364_v15  ;;  %v554_v51 = vpop.f32.mrb[41].mxu0 }
 0x133   :  { %v1368_v34 = vpack.c.bf16 %v712_v19, %v711_v22  ;;  %v555_v26 = vadd.f32 %v1728_v18, %v554_v51  ;;  %1367 = vmatprep.subr.bf16.mxu1 %v1787_v4  ;;  %v1422_v18 = vmov 0.0  }
 0x134   :  { %v714_v27 = vmax.f32 %v560_v25, 0.0 }
 0x135   :  { %v713_v28 = vmax.f32 %v555_v26, 0.0 }
 0x136   :  { %1369 = vmatpush3.bf16.msra.mxu1 %v1368_v34 }
 0x137   :  { %v1372_v29 = vpack.c.bf16 %v714_v27, %v713_v28  ;;  %1371 = vmatprep.subr.bf16.mxu1 %v1795_v23 }
 0x13a   :  { %1373 = vmatpush3.bf16.msra.mxu1 %v1372_v29 }
 0x13b   :  { %1375 = vmatprep.subr.bf16.mxu1 %v1801_v41 }
 0x13e   :  { %1377 = vmatpush3.bf16.msra.mxu1 %v1739_v39 }
 0x13f   :  { %1379 = vmatprep.subr.bf16.mxu1 %v1808_v59 }
 0x142   :  { %1381 = vmatpush3.bf16.msra.mxu1 %v1747_v53 }
 0x143   :  { %1383 = vmatprep.subr.bf16.mxu1 %v1814_v9 }
 0x146   :  { %1385 = vmatpush3.bf16.msra.mxu1 %v1755_v3 }
 0x147   :  { %1309 = vmatprep.subr.mxu1 %v1422_v18 }
 0x149   :  { %895 = vmatmul.mubr.f32.vlgmr.msra.gmra.mrb[24].mxu1 %v1723_v17  ;;  %v1060_v17 = vld [vmem:[%s1875_s2 + $0x38] ss:$0 sm:$0xff] }
 0x14a   :  { %1310 = vmatpush3.msra.mxu1 %v21_v50  ;;  %1311 = vmatprep.mubr.msk.f32.mxu1 %vm1423_vm2, %v1422_v18 }
 0x1fc   :  { %v1163_v39 = vpop.f32.mrb[22].mxu1 }
 0x1fd   :  { %v1164_v4 = vpop.f32.mrb[23].mxu1 }
 0x1fe   :  { %v1165_v23 = vadd.f32 %v1164_v4, %v1163_v39 }
 0x21c   :  { %v1198_v41 = vpop.f32.mrb[24].mxu1 }
 0x21d   :  { %v1199_v53 = vpop.f32.mrb[25].mxu1 }
 0x21e   :  { %v1200_v59 = vadd.f32 %v1199_v53, %v1198_v41 }
 0x220   :  { %v897_v9 = vadd.f32 %v1200_v59, %v1165_v23 }
 0x222   :  { %1312 = vmatmul.mubr.msk.f32.vlgmr.msra.gmra.mrb[26].mxu1 %vm904_vm3, %v897_v9 }
 0x2f5   :  { %v974_v3 = vpop.f32.mrb[26].mxu1 }
 0x2f6   :  { %v975_v30 = vadd.f32 %v1060_v17, %v974_v3  ;;  %v1313_v31 = vpop.f32.mrb[27].mxu1 }
 0x2f8   :  { %979 = vst.msk [vmem:[#allocation2] sm:$0x3] %vm978_vm4, %v975_v30 }
 0x2f9   :  { %1408 = shalt.err (!%p1405_p4)
}
 0x2fa   :  { %s1409_s26 = scalar_lea.hbm %s1876_s3, 32 }
 0x2fb   :  { %p1410_p5 = scmp.ne.s32.totalorder %s1876_s3, %s1409_s26  ;;  %p1413_p6 = scmp.lt.u32.totalorder %s1409_s26, %s1876_s3 }
 0x2fd   :  { %p1415_p7 = pnand %p1413_p6, %p1410_p5 }
 0x2ff   :  { %1418 = shalt.err (!%p1415_p7)
}
 0x300   :  { %989 = dma.vmem_to_hbm [thread:$0]  %s987_s22, 32, %s1876_s3, [#allocation3]  }
 0x301   :  { %1419 = dma.done.wait [#allocation3], 32  }
 0x302   :  { %1420 = vsyncadd [#allocation3], 4294967264 }
 0x303   :  { %993 = vsyncpa [#allocation3], 1 }

</bundles_post_ra>
